<compile_context>
chip_gen: v5e
topology: v5e:2x2
jax: 0.10.0
libtpu: 0.0.40
codegen_flags: <defaults>
</compile_context>

<pallas_src>
import functools

import jax
import jax.numpy as jnp
from jax.experimental import pallas as pl
from jax.experimental.pallas import tpu as pltpu

LN_EPS = 1e-5  # torch.nn.LayerNorm default


def _round_up(x, m):
    return (x + m - 1) // m * m


def _prenorm_linear_kernel(x_ref, w_ref, b_ref, o_ref, *, d):
    """One (row-tile, n-tile) block of: out = LayerNorm(x) @ W' + b'."""
    x = x_ref[...].astype(jnp.float32)                      # (TM, Dp), f32 stats
    inv_d = 1.0 / d
    # Padded columns of x are zero, so the sum only sees the real D columns.
    mean = jnp.sum(x, axis=-1, keepdims=True) * inv_d       # (TM, 1)
    centered = x - mean
    if x.shape[-1] != d:
        # Static branch: only emitted when D was zero-padded up to 128 lanes.
        col = jax.lax.broadcasted_iota(jnp.int32, x.shape, 1)
        centered = jnp.where(col < d, centered, 0.0)
    var = jnp.sum(centered * centered, axis=-1, keepdims=True) * inv_d  # biased, like torch
    x_hat = centered * jax.lax.rsqrt(var + LN_EPS)           # (TM, Dp)
    # MXU operands in the weight dtype (bf16 when available); accumulate in f32.
    y = x_hat.astype(w_ref.dtype)
    out = jnp.dot(y, w_ref[...], preferred_element_type=jnp.float32) + b_ref[...]
    o_ref[...] = out.astype(o_ref.dtype)


@functools.partial(jax.jit, static_argnames=("row_tile", "n_tile_max"))
def prenorm(x, gamma, beta, w, bias, *, row_tile=256, n_tile_max=512):
    """x: (B, S, D); gamma/beta/bias: (D,); w: (D, D) stored (in, out)."""
    B, S, D = x.shape
    rows = B * S

    # ---- Fold the LayerNorm affine into the linear layer (in f32): ---------
    #   (x_hat * gamma + beta) @ W + b  ==  x_hat @ (diag(gamma) @ W) + (beta @ W + b)
    gamma32 = gamma.astype(jnp.float32)
    beta32 = beta.astype(jnp.float32)
    w32 = w.astype(jnp.float32)
    w_folded = gamma32[:, None] * w32                         # (D, D)
    b_folded = beta32 @ w32 + bias.astype(jnp.float32)        # (D,)

    # MXU operand dtype: bf16 when both activations and weights are bf16.
    bf16 = jnp.dtype(jnp.bfloat16)
    use_bf16 = (jnp.dtype(x.dtype) == bf16) and (jnp.dtype(w.dtype) == bf16)
    mxu_dtype = jnp.bfloat16 if use_bf16 else jnp.float32

    # ---- Tiling / padding ---------------------------------------------------
    sub = 16 if jnp.dtype(x.dtype) == bf16 else 8             # sublane multiple
    tm = min(_round_up(row_tile, sub), _round_up(rows, sub))  # big tile, clamped to problem
    rows_p = _round_up(rows, tm)

    Dp = _round_up(D, 128)                                    # lane-dense contraction dim
    tn = Dp if Dp <= n_tile_max else n_tile_max               # output-column tile (v7x VMEM)
    Np = _round_up(Dp, tn)                                    # lane-dense output dim

    x2 = jnp.pad(x.reshape(rows, D), ((0, rows_p - rows), (0, Dp - D)))
    w_p = jnp.pad(w_folded, ((0, Dp - D), (0, Np - D))).astype(mxu_dtype)
    b_p = jnp.pad(b_folded, (0, Np - D)).reshape(1, Np)       # stays f32

    grid = (rows_p // tm, Np // tn)

    # ---- VMEM budget (double-buffered x/out/W blocks + bias) ---------------
    x_bytes = jnp.dtype(x.dtype).itemsize
    w_bytes = jnp.dtype(mxu_dtype).itemsize
    need = (2 * tm * Dp * x_bytes          # x tiles
            + 2 * tm * tn * x_bytes        # out tiles
            + 2 * Dp * tn * w_bytes        # W tile (constant index -> effectively resident)
            + 2 * tn * 4)                  # bias
    vmem_limit = int(min(max(2 * need, 32 << 20), 64 << 20))

    kernel = functools.partial(_prenorm_linear_kernel, d=D)

    out_p = pl.pallas_call(
        kernel,
        out_shape=jax.ShapeDtypeStruct((rows_p, Np), x.dtype),
        grid_spec=pltpu.PrefetchScalarGridSpec(
            num_scalar_prefetch=0,
            grid=grid,
            in_specs=[
                pl.BlockSpec((tm, Dp), lambda i, j: (i, 0)),   # x rows (resident across j)
                pl.BlockSpec((Dp, tn), lambda i, j: (0, j)),   # folded W columns
                pl.BlockSpec((1, tn), lambda i, j: (0, j)),    # folded bias
            ],
            out_specs=pl.BlockSpec((tm, tn), lambda i, j: (i, j)),
        ),
        compiler_params=pltpu.CompilerParams(
            dimension_semantics=("parallel", "parallel"),
            vmem_limit_bytes=vmem_limit,
        ),
    )(x2, w_p, b_p)

    return out_p[:rows, :D].reshape(B, S, D)


def prenorm_reference(x, gamma, beta, w, bias):
    """Pure-JAX reference mirroring torch: Linear(LayerNorm(x))."""
    xf = x.astype(jnp.float32)
    mean = jnp.mean(xf, axis=-1, keepdims=True)
    var = jnp.mean((xf - mean) ** 2, axis=-1, keepdims=True)
    x_hat = (xf - mean) / jnp.sqrt(var + LN_EPS)
    y = x_hat * gamma + beta
    return (y @ w.astype(jnp.float32) + bias).astype(x.dtype)


if __name__ == "__main__":
    # Small shapes consistent with the module: batch=2, seq=8, hidden(dim)=32.
    # TODO(synk): `fn` in PreNorm is an arbitrary sub-module; it is instantiated
    # here as Linear(dim, dim), the canonical transformer usage.
    B, S, D = 2, 8, 32
    key = jax.random.PRNGKey(0)
    kx, kg, kb, kw, kbias = jax.random.split(key, 5)

    x = jax.random.normal(kx, (B, S, D), dtype=jnp.float32)

    # Deterministic parameter init (torch defaults would be gamma=1, beta=0 —
    # perturb them so the folded affine path is exercised).
    gamma = 1.0 + 0.1 * jax.random.normal(kg, (D,), dtype=jnp.float32)
    beta = 0.1 * jax.random.normal(kb, (D,), dtype=jnp.float32)
    w = jax.random.normal(kw, (D, D), dtype=jnp.float32) / jnp.sqrt(D)
    bias = 0.05 * jax.random.normal(kbias, (D,), dtype=jnp.float32)

    out = prenorm(x, gamma, beta, w, bias)
    jax.block_until_ready(out)

    ref = prenorm_reference(x, gamma, beta, w, bias)
    assert out.shape == ref.shape
    assert jnp.allclose(out, ref, atol=1e-4, rtol=1e-4), "mismatch vs reference"

    print("KERNEL_OK")
</pallas_src>

<mosaic_0001>
module attributes {stable_mosaic.version = 11 : i64} {
  func.func @_prenorm_linear_kernel(%arg0: i32, %arg1: i32, %arg2: memref<16x128xf32, #tpu.memory_space<vmem>>, %arg3: memref<128x128xf32, #tpu.memory_space<vmem>>, %arg4: memref<1x128xf32, #tpu.memory_space<vmem>>, %arg5: memref<16x128xf32, #tpu.memory_space<vmem>>) attributes {dimension_semantics = [#tpu.dimension_semantics<parallel>, #tpu.dimension_semantics<parallel>], iteration_bounds = array<i64: 1, 1>, scalar_prefetch = 0 : i64, scratch_operands = 0 : i64, tpu.core_type = #tpu.core_type<tc>, window_params = [{transform_indices = @transform_0, window_bounds = array<i64: 16, 128>}, {transform_indices = @transform_1, window_bounds = array<i64: 128, 128>}, {transform_indices = @transform_2, window_bounds = array<i64: 1, 128>}, {transform_indices = @transform_3, window_bounds = array<i64: 16, 128>}]} {
    %c0 = arith.constant 0 : index
    %c0_0 = arith.constant 0 : index
    %0 = vector.load %arg2[%c0, %c0_0] : memref<16x128xf32, #tpu.memory_space<vmem>>, vector<16x128xf32>
    %cst = arith.constant dense<0.000000e+00> : vector<16xf32>
    %1 = vector.multi_reduction <add>, %0, %cst [1] : vector<16x128xf32> to vector<16xf32>
    %2 = vector.shape_cast %1 : vector<16xf32> to vector<16x1xf32>
    %cst_1 = arith.constant 3.125000e-02 : f32
    %3 = vector.broadcast %cst_1 : f32 to vector<16x1xf32>
    %4 = arith.mulf %2, %3 : vector<16x1xf32>
    %5 = vector.broadcast %4 : vector<16x1xf32> to vector<16x128xf32>
    %6 = arith.subf %0, %5 : vector<16x128xf32>
    %7 = tpu.iota {dimensions = array<i32: 1>} : vector<16x128xi32>
    %c32_i32 = arith.constant 32 : i32
    %8 = vector.broadcast %c32_i32 : i32 to vector<16x128xi32>
    %9 = arith.cmpi slt, %7, %8 : vector<16x128xi32>
    %cst_2 = arith.constant 0.000000e+00 : f32
    %10 = vector.broadcast %cst_2 : f32 to vector<16x128xf32>
    %11 = arith.select %9, %6, %10 : vector<16x128xi1>, vector<16x128xf32>
    %12 = arith.mulf %11, %11 : vector<16x128xf32>
    %cst_3 = arith.constant dense<0.000000e+00> : vector<16xf32>
    %13 = vector.multi_reduction <add>, %12, %cst_3 [1] : vector<16x128xf32> to vector<16xf32>
    %14 = vector.shape_cast %13 : vector<16xf32> to vector<16x1xf32>
    %cst_4 = arith.constant 3.125000e-02 : f32
    %15 = vector.broadcast %cst_4 : f32 to vector<16x1xf32>
    %16 = arith.mulf %14, %15 : vector<16x1xf32>
    %cst_5 = arith.constant 9.99999974E-6 : f32
    %17 = vector.broadcast %cst_5 : f32 to vector<16x1xf32>
    %18 = arith.addf %16, %17 : vector<16x1xf32>
    %19 = math.rsqrt %18 : vector<16x1xf32>
    %20 = vector.broadcast %19 : vector<16x1xf32> to vector<16x128xf32>
    %21 = arith.mulf %11, %20 : vector<16x128xf32>
    %c0_6 = arith.constant 0 : index
    %c0_7 = arith.constant 0 : index
    %22 = vector.load %arg3[%c0_6, %c0_7] : memref<128x128xf32, #tpu.memory_space<vmem>>, vector<128x128xf32>
    %cst_8 = arith.constant dense<0.000000e+00> : vector<16x128xf32>
    %23 = tpu.matmul %21, %22, %cst_8 {dimension_numbers = #tpu.dot_dimension_numbers<[1], [0], [0], [1], [0, 0, 1, 1], [], []>} : vector<16x128xf32>, vector<128x128xf32>, vector<16x128xf32> -> vector<16x128xf32>
    %c0_9 = arith.constant 0 : index
    %c0_10 = arith.constant 0 : index
    %24 = vector.load %arg4[%c0_9, %c0_10] : memref<1x128xf32, #tpu.memory_space<vmem>>, vector<1x128xf32>
    %25 = vector.broadcast %24 : vector<1x128xf32> to vector<16x128xf32>
    %26 = arith.addf %23, %25 : vector<16x128xf32>
    %c0_11 = arith.constant 0 : index
    %c0_12 = arith.constant 0 : index
    %27 = vector.load %arg5[%c0_11, %c0_12] : memref<16x128xf32, #tpu.memory_space<vmem>>, vector<16x128xf32>
    tpu.vector_store %arg5[%c0_11, %c0_12], %26 {strides = array<i32>} : memref<16x128xf32, #tpu.memory_space<vmem>>, vector<16x128xf32>,
    return
  }
  func.func @transform_0(%arg0: i32, %arg1: i32) -> (i32, i32) {
    %c0_i32 = arith.constant 0 : i32
    %c0_i32_0 = arith.constant 0 : i32
    return %arg0, %c0_i32 : i32, i32
  }
  func.func @transform_1(%arg0: i32, %arg1: i32) -> (i32, i32) {
    %c0_i32 = arith.constant 0 : i32
    %c0_i32_0 = arith.constant 0 : i32
    return %c0_i32, %arg1 : i32, i32
  }
  func.func @transform_2(%arg0: i32, %arg1: i32) -> (i32, i32) {
    %c0_i32 = arith.constant 0 : i32
    %c0_i32_0 = arith.constant 0 : i32
    return %c0_i32, %arg1 : i32, i32
  }
  func.func @transform_3(%arg0: i32, %arg1: i32) -> (i32, i32) {
    %c0_i32 = arith.constant 0 : i32
    return %arg0, %arg1 : i32, i32
  }
}

</mosaic_0001>

<bundles_post_ra>
// kernel: prenorm.1
= control target key start
LH: loop header
LB: loop body
LE: loop exit
PB: predicated region body
PF: predicated region fallthrough
CT: control target
= control target key end

     0   :  { %v24_v6 = vlaneseq  ;;  %s224_s0 = inlined_call_operand.vmem [shape: f32[16,128], index: 0, kind: input, shape index: {}]   ;;  %s225_s1 = inlined_call_operand.vmem [shape: f32[128,128], index: 1, kind: input, shape index: {}]   ;;  %s226_s2 = inlined_call_operand.vmem [shape: f32[1,128], index: 2, kind: input, shape index: {}]   ;;  %s227_s3 = inlined_call_operand.vmem [shape: f32[16,128], index: 3, kind: output, shape index: {}]  }
   0x1   :  { %v14_v0 = vld [vmem:[%s224_s0] sm:$0xff]  ;;  %v15_v1 = vld [vmem:[%s224_s0 + $0x8] sm:$0xff]  ;;  %v76_v2 = vld [vmem:[%s225_s1 + $0x78] sm:$0xff] }
   0x2   :  { %16 = vadd.xlane.f32.xlu0 %v14_v0  ;;  %v75_v3 = vld [vmem:[%s225_s1 + $0x70] sm:$0xff]  ;;  %81 = vmatpush.msra.mxu0 %v76_v2  ;;  %v74_v4 = vld [vmem:[%s225_s1 + $0x68] sm:$0xff]  ;;  %v73_v5 = vld [vmem:[%s225_s1 + $0x60] sm:$0xff]  ;;  %v25_v7 = vand.u32 127, %v24_v6 }
   0x3   :  { %110 = vmatpush.msra.mxu1 %v76_v2  ;;  %v72_v18 = vld [vmem:[%s225_s1 + $0x58] sm:$0xff]  ;;  %v71_v19 = vld [vmem:[%s225_s1 + $0x50] sm:$0xff]  ;;  %v70_v20 = vld [vmem:[%s225_s1 + $0x48] sm:$0xff] }
   0x4   :  { %82 = vmatpush.msra.mxu0 %v75_v3  ;;  %vm26_vm0 = vcmp.lt.s32.totalorder %v25_v7, 32  ;;  %v69_v21 = vld [vmem:[%s225_s1 + $0x40] sm:$0xff]  ;;  %v68_v22 = vld [vmem:[%s225_s1 + $0x38] sm:$0xff]  ;;  %v67_v23 = vld [vmem:[%s225_s1 + $0x30] sm:$0xff] }
   0x5   :  { %111 = vmatpush.msra.mxu1 %v75_v3  ;;  %v66_v24 = vld [vmem:[%s225_s1 + $0x28] sm:$0xff]  ;;  %v65_v25 = vld [vmem:[%s225_s1 + $0x20] sm:$0xff]  ;;  %v64_v26 = vld [vmem:[%s225_s1 + $0x18] sm:$0xff] }
   0x6   :  { %83 = vmatpush.msra.mxu0 %v74_v4  ;;  %v63_v27 = vld [vmem:[%s225_s1 + $0x10] sm:$0xff]  ;;  %v62_v28 = vld [vmem:[%s225_s1 + $0x8] sm:$0xff]  ;;  %v61_v29 = vld [vmem:[%s225_s1] sm:$0xff] }
   0x7   :  { %112 = vmatpush.msra.mxu1 %v74_v4  ;;  %v126_v52 = vld [vmem:[%s226_s2] ss:$0 sm:$0xff] }
   0x8   :  { %84 = vmatpush.msra.mxu0 %v73_v5 }
   0x9   :  { %113 = vmatpush.msra.mxu1 %v73_v5 }
   0xa   :  { %18 = vadd.xlane.f32.xlu0 %v15_v1  ;;  %85 = vmatpush.msra.mxu0 %v72_v18 }
   0xb   :  { %114 = vmatpush.msra.mxu1 %v72_v18 }
   0xc   :  { %86 = vmatpush.msra.mxu0 %v71_v19 }
   0xd   :  { %115 = vmatpush.msra.mxu1 %v71_v19 }
   0xe   :  { %87 = vmatpush.msra.mxu0 %v70_v20 }
   0xf   :  { %116 = vmatpush.msra.mxu1 %v70_v20 }
  0x10   :  { %88 = vmatpush.msra.mxu0 %v69_v21 }
  0x11   :  { %117 = vmatpush.msra.mxu1 %v69_v21 }
  0x12   :  { %89 = vmatpush.msra.mxu0 %v68_v22 }
  0x13   :  { %118 = vmatpush.msra.mxu1 %v68_v22 }
  0x14   :  { %90 = vmatpush.msra.mxu0 %v67_v23 }
  0x15   :  { %119 = vmatpush.msra.mxu1 %v67_v23 }
  0x16   :  { %91 = vmatpush.msra.mxu0 %v66_v24 }
  0x17   :  { %120 = vmatpush.msra.mxu1 %v66_v24 }
  0x18   :  { %92 = vmatpush.msra.mxu0 %v65_v25 }
  0x19   :  { %121 = vmatpush.msra.mxu1 %v65_v25 }
  0x1a   :  { %93 = vmatpush.msra.mxu0 %v64_v26 }
  0x1b   :  { %122 = vmatpush.msra.mxu1 %v64_v26 }
  0x1c   :  { %94 = vmatpush.msra.mxu0 %v63_v27 }
  0x1d   :  { %123 = vmatpush.msra.mxu1 %v63_v27 }
  0x1e   :  { %95 = vmatpush.msra.mxu0 %v62_v28 }
  0x1f   :  { %124 = vmatpush.msra.mxu1 %v62_v28 }
  0x20   :  { %96 = vmatpush.msra.mxu0 %v61_v29 }
  0x21   :  { %125 = vmatpush.msra.mxu1 %v61_v29 }
  0x75   :  { %v17_v8 = vpop.xlane.xlu0 %16 }
  0x76   :  { %v20_v9 = vmul.f32 0.03125, %v17_v8 }
  0x78   :  { %v22_v10 = vsub.f32 %v14_v0, %v20_v9 }
  0x7a   :  { %v169_v11 = vsel %vm26_vm0, %v22_v10, 0.0 }
  0x7b   :  { %v29_v12 = vmul.f32 %v169_v11, %v169_v11 }
  0x7d   :  { %31 = vadd.xlane.f32.xlu1 %v29_v12  ;;  %v19_v13 = vpop.xlane.xlu0 %18 }
  0x7e   :  { %v21_v14 = vmul.f32 0.03125, %v19_v13 }
  0x80   :  { %v23_v15 = vsub.f32 %v15_v1, %v21_v14 }
  0x82   :  { %v173_v16 = vsel %vm26_vm0, %v23_v15, 0.0 }
  0x83   :  { %v30_v17 = vmul.f32 %v173_v16, %v173_v16 }
  0x85   :  { %33 = vadd.xlane.f32.xlu1 %v30_v17 }
  0xf0   :  { %v32_v30 = vpop.xlane.xlu1 %31 }
  0xf1   :  { %v35_v31 = vmul.f32 0.03125, %v32_v30 }
  0xf3   :  { %v37_v32 = vadd.f32 1e-05, %v35_v31 }
  0xf5   :  { %127 = vrsqrt.f32 %v37_v32  ;;  %vm45_vm2 = vweird.f32 %v37_v32 }
  0xf8   :  { %v34_v33 = vpop.xlane.xlu1 %33 }
  0xf9   :  { %v36_v34 = vmul.f32 0.03125, %v34_v33 }
  0xfb   :  { %v128_v35 = vpop.eup %127  ;;  %v38_v36 = vadd.f32 1e-05, %v36_v34 }
  0xfc   :  { %v40_v37 = vmul.f32 %v128_v35, %v37_v32  ;;  %vm46_vm1 = vweird.f32 %v128_v35 }
  0xfd   :  { %129 = vrsqrt.f32 %v38_v36  ;;  %vm47_vm3 = vmor %vm45_vm2, %vm46_vm1  ;;  %vm55_vm5 = vweird.f32 %v38_v36 }
  0xfe   :  { %v41_v38 = vmul.f32 %v128_v35, %v40_v37 }
 0x100   :  { %v42_v39 = vmul.f32 0.5, %v41_v38 }
 0x102   :  { %v43_v40 = vsub.f32 1.5, %v42_v39 }
 0x103   :  { %v130_v41 = vpop.eup %129 }
 0x104   :  { %v50_v42 = vmul.f32 %v130_v41, %v38_v36  ;;  %v44_v43 = vmul.f32 %v128_v35, %v43_v40  ;;  %vm56_vm4 = vweird.f32 %v130_v41 }
 0x105   :  { %vm57_vm6 = vmor %vm55_vm5, %vm56_vm4 }
 0x106   :  { %v51_v44 = vmul.f32 %v130_v41, %v50_v42  ;;  %v48_v45 = vsel %vm47_vm3, %v128_v35, %v44_v43 }
 0x107   :  { %v59_v46 = vmul.f32 %v48_v45, %v169_v11 }
 0x108   :  { %v52_v47 = vmul.f32 0.5, %v51_v44 }
 0x109   :  { %97 = vmatmul.f32.vlgmr.msra.gmra.mxu0 %v59_v46 }
 0x10a   :  { %v53_v48 = vsub.f32 1.5, %v52_v47 }
 0x10c   :  { %v54_v49 = vmul.f32 %v130_v41, %v53_v48 }
 0x10e   :  { %v58_v50 = vsel %vm57_vm6, %v130_v41, %v54_v49 }
 0x10f   :  { %v60_v51 = vmul.f32 %v58_v50, %v173_v16 }
 0x111   :  { %100 = vmatmul.f32.vlgmr.msra.gmra.mxu1 %v60_v51 }
 0x186   :  { %v98_v53 = vpop.f32.mrf.mxu0 }
 0x187   :  { %v99_v54 = vadd.f32 %v126_v52, %v98_v53 }
 0x189   :  { %104 = vst [vmem:[%s227_s3] sm:$0xff] %v99_v54 }
 0x18e   :  { %v101_v55 = vpop.f32.mrf.mxu1 }
 0x18f   :  { %v102_v56 = vadd.f32 %v126_v52, %v101_v55 }
 0x191   :  { %105 = vst [vmem:[%s227_s3 + $0x8] sm:$0xff] %v102_v56 }

</bundles_post_ra>
